<compile_context>
chip_gen: v5e
topology: v5e:2x2
jax: 0.10.0
libtpu: 0.0.40
codegen_flags: <defaults>
</compile_context>

<pallas_src>
import functools

import jax
import jax.numpy as jnp
from jax.experimental import pallas as pl
from jax.experimental.pallas import tpu as pltpu


def _context_perception_kernel(x_ref, w_ref, b_ref, o_ref, *, inv_count):
    # x_ref: (TB, NC, C, HW_pad)   w_ref: (C, D)   b_ref: (1, D)   o_ref: (TB, D)
    x = x_ref[...].astype(jnp.float32)
    # Sum over the context axis first (pure VPU adds of (C, HW) slabs), then one
    # lane reduction over the padded spatial axis -> pooled features (TB, C).
    s = jnp.sum(x, axis=1)                       # (TB, C, HW_pad)
    feat = jnp.sum(s, axis=-1) * inv_count       # (TB, C) == mean over NC and HW
    # Affine head applied once per batch row (mean commutes with Linear+bias).
    y = jnp.dot(feat, w_ref[...], preferred_element_type=jnp.float32) + b_ref[...]
    o_ref[...] = y.astype(o_ref.dtype)


def context_perception_forward(x, w, b, *, vmem_budget_bytes=20 * 1024 * 1024):
    """x: (B, NC, C, H, W); w: (C, D); b: (1, D). Returns (B, D) float32."""
    B, NC, C, H, W = x.shape
    D = w.shape[1]
    HW = H * W

    # Lane-align the spatial axis: pad with zeros, divide by the true count.
    HW_pad = ((HW + 127) // 128) * 128
    xr = x.reshape(B, NC, C, HW)
    if HW_pad != HW:
        xr = jnp.pad(xr, ((0, 0), (0, 0), (0, 0), (0, HW_pad - HW)))

    # Batch tile: fill sublanes and the double-buffered VMEM budget, but keep
    # >= 2 parallel grid steps when the batch allows (v7x has 2 TensorCores).
    row_bytes = NC * C * HW_pad * xr.dtype.itemsize
    max_tb = max(1, vmem_budget_bytes // (2 * row_bytes))
    if B <= 8:
        tb = B  # full-extent batch block; splitting below sublane width is not worth it
    else:
        tb = min(max_tb, (B + 1) // 2)
        tb = max(8, (tb // 8) * 8)     # sublane-aligned block rows
        tb = min(tb, B)
    grid_b = pl.cdiv(B, tb)

    kernel = functools.partial(_context_perception_kernel,
                               inv_count=1.0 / float(NC * HW))

    out = pl.pallas_call(
        kernel,
        out_shape=jax.ShapeDtypeStruct((B, D), jnp.float32),
        grid_spec=pltpu.PrefetchScalarGridSpec(
            num_scalar_prefetch=0,
            grid=(grid_b,),
            in_specs=[
                pl.BlockSpec((tb, NC, C, HW_pad), lambda i: (i, 0, 0, 0)),
                pl.BlockSpec((C, D), lambda i: (0, 0)),
                pl.BlockSpec((1, D), lambda i: (0, 0)),
            ],
            out_specs=pl.BlockSpec((tb, D), lambda i: (i, 0)),
        ),
        compiler_params=pltpu.CompilerParams(
            dimension_semantics=("parallel",),
            vmem_limit_bytes=48 * 1024 * 1024,
        ),
    )(xr, w, b)
    return out


def _reference(x, w, b):
    B, NC, C, H, W = x.shape
    xf = x.reshape(B * NC, C, H * W)
    feat = jnp.mean(xf, axis=-1)          # GAP          -> (B*NC, C)
    y = feat @ w + b                      # Linear head  -> (B*NC, D)
    y = y.reshape(B, NC, -1)
    return jnp.mean(y, axis=1)            # context mean -> (B, D)


if __name__ == "__main__":
    # Small shapes implied by the forward: (batch, num_context, channels, H, W)
    B, NC, C, H, W = 2, 3, 4, 16, 16
    D = 32  # perception feature vector length

    key = jax.random.PRNGKey(0)
    kx, kw, kb = jax.random.split(key, 3)
    x = jax.random.normal(kx, (B, NC, C, H, W), dtype=jnp.float32)
    # Deterministic synthetic perception-model parameters.
    # TODO(synk): the PyTorch module wraps an arbitrary perception_model; only a
    # GAP + Linear head is implemented in-kernel.
    w = jax.random.normal(kw, (C, D), dtype=jnp.float32) * 0.1
    b = jax.random.normal(kb, (1, D), dtype=jnp.float32) * 0.01

    out = jax.block_until_ready(context_perception_forward(x, w, b))
    ref = _reference(x, w, b)
    assert out.shape == (B, D)
    assert jnp.allclose(out, ref, atol=1e-5, rtol=1e-5), (out, ref)
    print("KERNEL_OK")
</pallas_src>

<mosaic_0001>
module attributes {stable_mosaic.version = 11 : i64} {
  func.func @_context_perception_kernel(%arg0: i32, %arg1: memref<2x3x4x256xf32, #tpu.memory_space<vmem>>, %arg2: memref<4x32xf32, #tpu.memory_space<vmem>>, %arg3: memref<1x32xf32, #tpu.memory_space<vmem>>, %arg4: memref<2x32xf32, #tpu.memory_space<vmem>>) attributes {dimension_semantics = [#tpu.dimension_semantics<parallel>], iteration_bounds = array<i64: 1>, scalar_prefetch = 0 : i64, scratch_operands = 0 : i64, tpu.core_type = #tpu.core_type<tc>, window_params = [{transform_indices = @transform_0, window_bounds = array<i64: 2, 3, 4, 256>}, {pipeline_mode = #tpu.pipeline_mode<synchronous>, transform_indices = @transform_1, window_bounds = array<i64: 4, 32>}, {pipeline_mode = #tpu.pipeline_mode<synchronous>, transform_indices = @transform_2, window_bounds = array<i64: 1, 32>}, {transform_indices = @transform_3, window_bounds = array<i64: 2, 32>}]} {
    %c0 = arith.constant 0 : index
    %c0_0 = arith.constant 0 : index
    %c0_1 = arith.constant 0 : index
    %c0_2 = arith.constant 0 : index
    %0 = vector.load %arg1[%c0, %c0_0, %c0_1, %c0_2] : memref<2x3x4x256xf32, #tpu.memory_space<vmem>>, vector<2x3x4x256xf32>
    %cst = arith.constant dense<0.000000e+00> : vector<2x4x256xf32>
    %1 = vector.multi_reduction <add>, %0, %cst [1] : vector<2x3x4x256xf32> to vector<2x4x256xf32>
    %cst_3 = arith.constant dense<0.000000e+00> : vector<2x4xf32>
    %2 = vector.multi_reduction <add>, %1, %cst_3 [2] : vector<2x4x256xf32> to vector<2x4xf32>
    %cst_4 = arith.constant 0.00130208337 : f32
    %3 = vector.broadcast %cst_4 : f32 to vector<2x4xf32>
    %4 = arith.mulf %2, %3 : vector<2x4xf32>
    %c0_5 = arith.constant 0 : index
    %c0_6 = arith.constant 0 : index
    %5 = vector.load %arg2[%c0_5, %c0_6] : memref<4x32xf32, #tpu.memory_space<vmem>>, vector<4x32xf32>
    %cst_7 = arith.constant dense<0.000000e+00> : vector<2x32xf32>
    %6 = tpu.matmul %4, %5, %cst_7 {dimension_numbers = #tpu.dot_dimension_numbers<[1], [0], [0], [1], [0, 0, 1, 1], [], []>} : vector<2x4xf32>, vector<4x32xf32>, vector<2x32xf32> -> vector<2x32xf32>
    %c0_8 = arith.constant 0 : index
    %c0_9 = arith.constant 0 : index
    %7 = vector.load %arg3[%c0_8, %c0_9] : memref<1x32xf32, #tpu.memory_space<vmem>>, vector<1x32xf32>
    %8 = vector.broadcast %7 : vector<1x32xf32> to vector<2x32xf32>
    %9 = arith.addf %6, %8 : vector<2x32xf32>
    %c0_10 = arith.constant 0 : index
    %c0_11 = arith.constant 0 : index
    %10 = vector.load %arg4[%c0_10, %c0_11] : memref<2x32xf32, #tpu.memory_space<vmem>>, vector<2x32xf32>
    tpu.vector_store %arg4[%c0_10, %c0_11], %9 {strides = array<i32>} : memref<2x32xf32, #tpu.memory_space<vmem>>, vector<2x32xf32>,
    return
  }
  func.func @transform_0(%arg0: i32) -> (i32, i32, i32, i32) {
    %c0_i32 = arith.constant 0 : i32
    %c0_i32_0 = arith.constant 0 : i32
    %c0_i32_1 = arith.constant 0 : i32
    %c0_i32_2 = arith.constant 0 : i32
    return %arg0, %c0_i32, %c0_i32_0, %c0_i32_1 : i32, i32, i32, i32
  }
  func.func @transform_1(%arg0: i32) -> (i32, i32) {
    %c0_i32 = arith.constant 0 : i32
    %c0_i32_0 = arith.constant 0 : i32
    %c0_i32_1 = arith.constant 0 : i32
    return %c0_i32, %c0_i32_0 : i32, i32
  }
  func.func @transform_2(%arg0: i32) -> (i32, i32) {
    %c0_i32 = arith.constant 0 : i32
    %c0_i32_0 = arith.constant 0 : i32
    %c0_i32_1 = arith.constant 0 : i32
    return %c0_i32, %c0_i32_0 : i32, i32
  }
  func.func @transform_3(%arg0: i32) -> (i32, i32) {
    %c0_i32 = arith.constant 0 : i32
    %c0_i32_0 = arith.constant 0 : i32
    return %arg0, %c0_i32 : i32, i32
  }
}

</mosaic_0001>

<bundles_post_ra>
// kernel: tpu_custom_call.1
= control target key start
LH: loop header
LB: loop body
LE: loop exit
PB: predicated region body
PF: predicated region fallthrough
CT: control target
= control target key end

     0   :  { %8 = vsyncpa [#allocation3], 0  ;;  %s322_s0 = inlined_call_operand.hbm [shape: f32[2,3,4,256], index: 0, kind: input, shape index: {}]   ;;  %s323_s1 = inlined_call_operand.hbm [shape: f32[4,32], index: 1, kind: input, shape index: {}]   ;;  %s324_s2 = inlined_call_operand.vmem [shape: f32[1,32], index: 2, kind: input, shape index: {}]   ;;  %s325_s3 = inlined_call_operand.hbm [shape: f32[2,32], index: 3, kind: output, shape index: {}]  }
   0x1   :  { %9 = vsyncpa [#allocation6], 0 }
   0x2   :  { %10 = vsyncpa [#allocation4], 0  ;;  %s15_s14 = sshll.u32 %s322_s0, 4  ;;  %s268_s15 = smov [#allocation2]   ;;  %s16_s14 = int_to_ptr.hbm [resolvable:$true] %s15_s14 }
   0x3   :  { %s17_s16 = sshll.u32 %s268_s15, 4  ;;  %s29_s19 = sshll.u32 %s323_s1, 4  ;;  %s18_s16 = int_to_ptr.vmem [resolvable:$true] %s17_s16  ;;  %s30_s19 = int_to_ptr.hbm [resolvable:$true] %s29_s19 }
   0x4   :  { %s269_s20 = smov 128   ;;  %s270_s21 = smov 8  }
   0x5   :  { %23 = dma.hbm_to_vmem [thread:$0]  %s16_s14, 768, %s18_s16, [#allocation3], %s269_s20, %s269_s20, %s270_s21  }
   0x6   :  { %s271_s22 = smov [#allocation5]  }
   0x7   :  { %s31_s23 = sshll.u32 %s271_s22, 4  ;;  %s32_s23 = int_to_ptr.vmem [resolvable:$true] %s31_s23 }
   0x8   :  { %34 = dma.hbm_to_vmem [thread:$0]  %s30_s19, 64, %s32_s23, [#allocation6]  }
   0x9   :  { %262 = dma.done.wait [#allocation3], 768  }
   0xa   :  { %263 = vsyncadd [#allocation3], 4294966528 }
   0xb   :  { %264 = dma.done.wait [#allocation6], 64  }
   0xc   :  { %265 = vsyncadd [#allocation6], 4294967232  ;;  %v45_v0 = vld [vmem:[#allocation2] sm:$0xff]  ;;  %v46_v1 = vld [vmem:[#allocation2 + $0x8] sm:$0xff]  ;;  %vm90_vm0 = vcmask 1043456   ;;  %v130_v46 = vlaneseq  ;;  %vm134_vm1 = vcmask 1041409  }
   0xd   :  { %v47_v2 = vld [vmem:[#allocation2 + $0x10] sm:$0xff]  ;;  %57 = vst [vmem:[#allocation1] ss:$2 sm:$0xff] %v45_v0  ;;  %v48_v3 = vld [vmem:[#allocation2 + $0x18] sm:$0xff]  ;;  %v49_v4 = vld [vmem:[#allocation2 + $0x20] sm:$0xff]  ;;  %vm136_vm2 = vcmask 31744  }
   0xe   :  { %61 = vst [vmem:[#allocation1 + $0x10] ss:$2 sm:$0xff] %v46_v1  ;;  %v50_v5 = vld [vmem:[#allocation2 + $0x28] sm:$0xff]  ;;  %v123_v44 = vld [vmem:[#allocation5] sm:$0xf]  ;;  %v131_v47 = vand.u32 127, %v130_v46 }
   0xf   :  { %65 = vst [vmem:[#allocation1 + $0x20] ss:$2 sm:$0xff] %v47_v2  ;;  %182 = vmatpush.msk.msra.mxu0 %vm90_vm0, %v123_v44  ;;  %v189_v54 = vld [vmem:[%s324_s2] ss:$0 sm:$0xff]  ;;  %s272_s24 = smov [#allocation7]   ;;  %s171_s28 = sshll.u32 %s325_s3, 4  ;;  %s172_s28 = int_to_ptr.hbm [resolvable:$true] %s171_s28 }
  0x10   :  { %69 = vst [vmem:[#allocation1 + $0x30] ss:$2 sm:$0xff] %v48_v3  ;;  %s169_s25 = sshll.u32 %s272_s24, 4  ;;  %vm162_vm3 = vcmask 254976   ;;  %s170_s25 = int_to_ptr.vmem [resolvable:$true] %s169_s25 }
  0x14   :  { %v58_v6 = vld.sshfl [vmem:[#allocation1] sm:$0xff pattern:$0x75316420]  ;;  %v59_v7 = vld.sshfl [vmem:[#allocation1 + $0x8] sm:$0xff pattern:$0x75316420] }
  0x15   :  { %v62_v8 = vld.sshfl [vmem:[#allocation1 + $0x10] sm:$0xff pattern:$0x75316420]  ;;  %v63_v9 = vld.sshfl [vmem:[#allocation1 + $0x18] sm:$0xff pattern:$0x75316420] }
  0x16   :  { %v66_v10 = vld.sshfl [vmem:[#allocation1 + $0x20] sm:$0xff pattern:$0x75316420]  ;;  %v67_v11 = vld.sshfl [vmem:[#allocation1 + $0x28] sm:$0xff pattern:$0x75316420] }
  0x17   :  { %75 = vst [vmem:[#allocation1 + $0x10] ss:$2 sm:$0xff] %v50_v5  ;;  %v91_v12 = vsel %vm90_vm0, %v58_v6, 0.0  ;;  %v92_v13 = vsel %vm90_vm0, %v62_v8, 0.0  ;;  %v94_v14 = vsel %vm90_vm0, %v66_v10, 0.0  ;;  %v96_v15 = vsel %vm90_vm0, %v59_v7, 0.0 }
  0x18   :  { %v93_v16 = vadd.f32 %v92_v13, %v91_v12  ;;  %v97_v17 = vsel %vm90_vm0, %v63_v9, 0.0  ;;  %v99_v18 = vsel %vm90_vm0, %v67_v11, 0.0  ;;  %72 = vst [vmem:[#allocation1] ss:$2 sm:$0xff] %v49_v4 }
  0x19   :  { %v98_v19 = vadd.f32 %v97_v17, %v96_v15  ;;  %v70_v21 = vld.sshfl [vmem:[#allocation1 + $0x30] sm:$0xff pattern:$0x75316420]  ;;  %v71_v22 = vld.sshfl [vmem:[#allocation1 + $0x38] sm:$0xff pattern:$0x75316420] }
  0x1a   :  { %v95_v20 = vadd.f32 %v94_v14, %v93_v16  ;;  %v101_v26 = vsel %vm90_vm0, %v70_v21, 0.0  ;;  %v106_v27 = vsel %vm90_vm0, %v71_v22, 0.0 }
  0x1b   :  { %v100_v23 = vadd.f32 %v99_v18, %v98_v19 }
  0x1c   :  { %v111_v24 = vsel %vm90_vm0, %v95_v20, 0.0 }
  0x1d   :  { %v112_v25 = vsel %vm90_vm0, %v100_v23, 0.0 }
  0x1e   :  { %v113_v28 = vadd.f32 %v112_v25, %v111_v24  ;;  %v76_v29 = vld.sshfl [vmem:[#allocation1 + $0x10] sm:$0xff pattern:$0x75316420]  ;;  %v77_v30 = vld.sshfl [vmem:[#allocation1 + $0x18] sm:$0xff pattern:$0x75316420] }
  0x1f   :  { %v73_v31 = vld.sshfl [vmem:[#allocation1] sm:$0xff pattern:$0x75316420]  ;;  %v74_v32 = vld.sshfl [vmem:[#allocation1 + $0x8] sm:$0xff pattern:$0x75316420] }
  0x20   :  { %114 = vadd.xlane.f32.xlu0 %v113_v28  ;;  %v102_v33 = vsel %vm90_vm0, %v73_v31, 0.0  ;;  %v104_v34 = vsel %vm90_vm0, %v76_v29, 0.0  ;;  %v107_v35 = vsel %vm90_vm0, %v74_v32, 0.0  ;;  %v109_v36 = vsel %vm90_vm0, %v77_v30, 0.0 }
  0x21   :  { %v103_v37 = vadd.f32 %v102_v33, %v101_v26  ;;  %v108_v38 = vadd.f32 %v107_v35, %v106_v27 }
  0x23   :  { %v105_v39 = vadd.f32 %v104_v34, %v103_v37  ;;  %v110_v40 = vadd.f32 %v109_v36, %v108_v38 }
  0x25   :  { %v116_v41 = vsel %vm90_vm0, %v105_v39, 0.0  ;;  %v117_v42 = vsel %vm90_vm0, %v110_v40, 0.0 }
  0x26   :  { %v118_v43 = vadd.f32 %v117_v42, %v116_v41 }
  0x28   :  { %119 = vadd.xlane.f32.xlu0 %v118_v43 }
  0x93   :  { %v115_v45 = vpop.xlane.xlu0 %114 }
  0x94   :  { %v121_v48 = vmul.f32 0.0013020834, %v115_v45 }
  0x96   :  { %v132_v51 = vperm.slane %v121_v48, %v131_v47 }
  0x9b   :  { %v120_v49 = vpop.xlane.xlu0 %119 }
  0x9c   :  { %v122_v50 = vmul.f32 0.0013020834, %v120_v49 }
  0x9e   :  { %v133_v52 = vperm.slane %v122_v50, %v131_v47 }
  0xa0   :  { %v135_v53 = vsel %vm134_vm1, %v133_v52, %v132_v51 }
  0xa1   :  { %183 = vmatmul.msk.f32.vlgmr.msra.gmra.mxu0 %vm136_vm2, %v135_v53 }
 0x11e   :  { %v159_v55 = vpop.f32.mrf.mxu0 }
 0x11f   :  { %v160_v56 = vadd.f32 %v189_v54, %v159_v55 }
 0x121   :  { %163 = vst.msk [vmem:[#allocation7] sm:$0x3] %vm162_vm3, %v160_v56 }
 0x122   :  { %174 = dma.vmem_to_hbm [thread:$0]  %s170_s25, 32, %s172_s28, [#allocation4]  }
 0x123   :  { %266 = dma.done.wait [#allocation4], 32  }
 0x124   :  { %267 = vsyncadd [#allocation4], 4294967264 }
 0x125   :  { %179 = vsyncpa [#allocation3], 1 }
 0x126   :  { %180 = vsyncpa [#allocation6], 1 }
 0x127   :  { %181 = vsyncpa [#allocation4], 1 }

</bundles_post_ra>
